<compile_context>
chip_gen: v7x
topology: tpu7x:2x2x1
jax: 0.10.0
libtpu: 0.0.40
codegen_flags: <defaults>
</compile_context>

<pallas_src>
import jax
import jax.numpy as jnp
from jax.experimental import pallas as pl
from jax.experimental.pallas import tpu as pltpu


SEQ_LEN = 96       # Config.seq_len
PRED_LEN = 24      # Config.pred_len
HIDDEN = 256
TILE_B_MAX = 512   # per-step batch tile cap (sweep 512-1024 if B is huge)


def _round_up(x, m):
    return ((x + m - 1) // m) * m


def _mlp_kernel(x_ref, w1_ref, b1_ref, w2_ref, b2_ref, o_ref):
    # x_ref : (TILE_B, in_feat)      f32   (cast to bf16 here, not in the wrapper)
    # w1_ref: (in_feat, HIDDEN)      bf16   b1_ref: (1, HIDDEN)   f32
    # w2_ref: (HIDDEN, out_pad)      bf16   b2_ref: (1, out_pad)  f32
    # o_ref : (TILE_B, out_pad)      f32    (lane-dense: out_pad % 128 == 0)
    x = x_ref[...].astype(jnp.bfloat16)
    h = jnp.dot(x, w1_ref[...], preferred_element_type=jnp.float32)
    h = jnp.maximum(h + b1_ref[...], 0.0)                       # f32 bias + ReLU
    o = jnp.dot(h.astype(jnp.bfloat16), w2_ref[...],
                preferred_element_type=jnp.float32) + b2_ref[...]
    o_ref[...] = o.astype(o_ref.dtype)


def simple_autoformer_forward(x, w1, b1, w2, b2):
    """x: (B, seq_len, input_dim) float32 -> (B, pred_len, input_dim) float32."""
    B, L, D = x.shape
    assert L == SEQ_LEN
    in_feat = L * D
    out_feat = PRED_LEN * D

    # --- wrapper-side layout plumbing (pure glue) ---
    out_pad = _round_up(out_feat, 128)                 # lane-dense output columns

    # Batch tiling: no wrapper pad; cdiv grid with a masked boundary block.
    if B <= 16:
        tile_b = _round_up(B, 8)                       # single small tile
    else:
        # >= 2 grid steps so "parallel" actually uses both TCs on v7x.
        tile_b = min(TILE_B_MAX, _round_up(pl.cdiv(B, 2), 8))
    num_b_tiles = pl.cdiv(B, tile_b)

    x_flat = x.reshape(B, in_feat).astype(jnp.float32)  # stays f32; bf16 cast in-kernel

    w1_bf = w1.astype(jnp.bfloat16)
    w2_bf = w2.astype(jnp.bfloat16)
    if out_pad != out_feat:
        w2_bf = jnp.pad(w2_bf, ((0, 0), (0, out_pad - out_feat)))
        b2_p = jnp.pad(b2, ((0, out_pad - out_feat),))
    else:
        b2_p = b2
    b1_2d = b1.reshape(1, HIDDEN).astype(jnp.float32)
    b2_2d = b2_p.reshape(1, out_pad).astype(jnp.float32)

    flops = 2 * B * (in_feat * HIDDEN + HIDDEN * out_pad)
    bytes_accessed = (B * in_feat * 4                      # x (f32)
                      + in_feat * HIDDEN * 2               # w1 (bf16)
                      + HIDDEN * out_pad * 2               # w2 (bf16)
                      + (HIDDEN + out_pad) * 4             # biases
                      + B * out_pad * 4)                   # output (f32)

    out_flat = pl.pallas_call(
        _mlp_kernel,
        out_shape=jax.ShapeDtypeStruct((B, out_pad), jnp.float32),
        grid=(num_b_tiles,),
        in_specs=[
            pl.BlockSpec((tile_b, in_feat), lambda i: (i, 0)),      # x: tiled over batch
            pl.BlockSpec((in_feat, HIDDEN), lambda i: (0, 0)),      # w1: VMEM-resident
            pl.BlockSpec((1, HIDDEN), lambda i: (0, 0)),            # b1: VMEM-resident
            pl.BlockSpec((HIDDEN, out_pad), lambda i: (0, 0)),      # w2: VMEM-resident
            pl.BlockSpec((1, out_pad), lambda i: (0, 0)),           # b2: VMEM-resident
        ],
        out_specs=pl.BlockSpec((tile_b, out_pad), lambda i: (i, 0)),
        compiler_params=pltpu.CompilerParams(
            # Batch tiles are independent -> parallel (uses both TCs on v7x).
            dimension_semantics=("parallel",),
        ),
        cost_estimate=pl.CostEstimate(
            flops=flops, transcendentals=0, bytes_accessed=bytes_accessed),
    )(x_flat, w1_bf, b1_2d, w2_bf, b2_2d)

    # Strip lane padding (no-op slice when out_feat % 128 == 0), restore (B, pred_len, D).
    return out_flat[:, :out_feat].reshape(B, PRED_LEN, D)


def init_params(key, input_dim):
    """PyTorch nn.Linear-style init (U[-1/sqrt(fan_in), 1/sqrt(fan_in)]).
    Weights stored as (in, out) = transpose of PyTorch's (out, in)."""
    in_feat = SEQ_LEN * input_dim
    out_feat = PRED_LEN * input_dim
    k1, k2, k3, k4 = jax.random.split(key, 4)

    bound1 = 1.0 / (in_feat ** 0.5)
    w1 = jax.random.uniform(k1, (in_feat, HIDDEN), jnp.float32, -bound1, bound1)
    b1 = jax.random.uniform(k2, (HIDDEN,), jnp.float32, -bound1, bound1)

    bound2 = 1.0 / (HIDDEN ** 0.5)
    w2 = jax.random.uniform(k3, (HIDDEN, out_feat), jnp.float32, -bound2, bound2)
    b2 = jax.random.uniform(k4, (out_feat,), jnp.float32, -bound2, bound2)
    return w1, b1, w2, b2


if __name__ == "__main__":
    key = jax.random.PRNGKey(0)
    k_x, k_p = jax.random.split(key)

    B = 2
    INPUT_DIM = 4  # fc1 in = 96*4 = 384, fc2 out = 24*4 = 96 (padded to 128 in-kernel)

    x = jax.random.normal(k_x, (B, SEQ_LEN, INPUT_DIM), jnp.float32)
    w1, b1, w2, b2 = init_params(k_p, INPUT_DIM)

    out = simple_autoformer_forward(x, w1, b1, w2, b2)
    out = jax.block_until_ready(out)
    assert out.shape == (B, PRED_LEN, INPUT_DIM)

    # Reference 1: same bf16-input / f32-accumulate math in plain JAX (tight check).
    x_flat = x.reshape(B, -1)
    xb, w1b, w2b = (x_flat.astype(jnp.bfloat16), w1.astype(jnp.bfloat16),
                    w2.astype(jnp.bfloat16))
    h = jnp.maximum(jnp.dot(xb, w1b, preferred_element_type=jnp.float32) + b1, 0.0)
    ref_bf = (jnp.dot(h.astype(jnp.bfloat16), w2b,
                      preferred_element_type=jnp.float32) + b2).reshape(B, PRED_LEN, -1)
    assert jnp.allclose(out, ref_bf, atol=1e-2, rtol=1e-2)

    # Reference 2: full f32 PyTorch-equivalent math (loose check; bf16 MXU inputs).
    ref_f32 = (jnp.maximum(x_flat @ w1 + b1, 0.0) @ w2 + b2).reshape(B, PRED_LEN, -1)
    assert jnp.allclose(out, ref_f32, atol=5e-2, rtol=5e-2)

    print("KERNEL_OK")
</pallas_src>

<mosaic_0001>
module attributes {stable_mosaic.version = 11 : i64} {
  func.func @_mlp_kernel(%arg0: i32, %arg1: memref<8x384xf32, #tpu.memory_space<vmem>>, %arg2: memref<384x256xbf16, #tpu.memory_space<vmem>>, %arg3: memref<1x256xf32, #tpu.memory_space<vmem>>, %arg4: memref<256x128xbf16, #tpu.memory_space<vmem>>, %arg5: memref<1x128xf32, #tpu.memory_space<vmem>>, %arg6: memref<8x128xf32, #tpu.memory_space<vmem>>) attributes {dimension_semantics = [#tpu.dimension_semantics<parallel>], iteration_bounds = array<i64: 1>, scalar_prefetch = 0 : i64, scratch_operands = 0 : i64, tpu.core_type = #tpu.core_type<tc>, window_params = [{transform_indices = @transform_0, window_bounds = array<i64: 8, 384>}, {pipeline_mode = #tpu.pipeline_mode<synchronous>, transform_indices = @transform_1, window_bounds = array<i64: 384, 256>}, {pipeline_mode = #tpu.pipeline_mode<synchronous>, transform_indices = @transform_2, window_bounds = array<i64: 1, 256>}, {pipeline_mode = #tpu.pipeline_mode<synchronous>, transform_indices = @transform_3, window_bounds = array<i64: 256, 128>}, {pipeline_mode = #tpu.pipeline_mode<synchronous>, transform_indices = @transform_4, window_bounds = array<i64: 1, 128>}, {transform_indices = @transform_5, window_bounds = array<i64: 8, 128>}]} {
    %c0 = arith.constant 0 : index
    %c0_0 = arith.constant 0 : index
    %0 = vector.load %arg1[%c0, %c0_0] : memref<8x384xf32, #tpu.memory_space<vmem>>, vector<8x384xf32>
    %1 = arith.truncf %0 : vector<8x384xf32> to vector<8x384xbf16>
    %c0_1 = arith.constant 0 : index
    %c0_2 = arith.constant 0 : index
    %2 = vector.load %arg2[%c0_1, %c0_2] : memref<384x256xbf16, #tpu.memory_space<vmem>>, vector<384x256xbf16>
    %cst = arith.constant dense<0.000000e+00> : vector<8x256xf32>
    %3 = tpu.matmul %1, %2, %cst {dimension_numbers = #tpu.dot_dimension_numbers<[1], [0], [0], [1], [0, 0, 1, 1], [], []>} : vector<8x384xbf16>, vector<384x256xbf16>, vector<8x256xf32> -> vector<8x256xf32>
    %c0_3 = arith.constant 0 : index
    %c0_4 = arith.constant 0 : index
    %4 = vector.load %arg3[%c0_3, %c0_4] : memref<1x256xf32, #tpu.memory_space<vmem>>, vector<1x256xf32>
    %5 = vector.broadcast %4 : vector<1x256xf32> to vector<8x256xf32>
    %6 = arith.addf %3, %5 : vector<8x256xf32>
    %cst_5 = arith.constant 0.000000e+00 : f32
    %7 = vector.broadcast %cst_5 : f32 to vector<8x256xf32>
    %8 = arith.maximumf %6, %7 : vector<8x256xf32>
    %9 = arith.truncf %8 : vector<8x256xf32> to vector<8x256xbf16>
    %c0_6 = arith.constant 0 : index
    %c0_7 = arith.constant 0 : index
    %10 = vector.load %arg4[%c0_6, %c0_7] : memref<256x128xbf16, #tpu.memory_space<vmem>>, vector<256x128xbf16>
    %cst_8 = arith.constant dense<0.000000e+00> : vector<8x128xf32>
    %11 = tpu.matmul %9, %10, %cst_8 {dimension_numbers = #tpu.dot_dimension_numbers<[1], [0], [0], [1], [0, 0, 1, 1], [], []>} : vector<8x256xbf16>, vector<256x128xbf16>, vector<8x128xf32> -> vector<8x128xf32>
    %c0_9 = arith.constant 0 : index
    %c0_10 = arith.constant 0 : index
    %12 = vector.load %arg5[%c0_9, %c0_10] : memref<1x128xf32, #tpu.memory_space<vmem>>, vector<1x128xf32>
    %13 = vector.broadcast %12 : vector<1x128xf32> to vector<8x128xf32>
    %14 = arith.addf %11, %13 : vector<8x128xf32>
    %c0_11 = arith.constant 0 : index
    %c0_12 = arith.constant 0 : index
    %15 = vector.load %arg6[%c0_11, %c0_12] : memref<8x128xf32, #tpu.memory_space<vmem>>, vector<8x128xf32>
    tpu.vector_store %arg6[%c0_11, %c0_12], %14 {strides = array<i32>} : memref<8x128xf32, #tpu.memory_space<vmem>>, vector<8x128xf32>,
    return
  }
  func.func @transform_0(%arg0: i32) -> (i32, i32) {
    %c0_i32 = arith.constant 0 : i32
    %c0_i32_0 = arith.constant 0 : i32
    return %arg0, %c0_i32 : i32, i32
  }
  func.func @transform_1(%arg0: i32) -> (i32, i32) {
    %c0_i32 = arith.constant 0 : i32
    %c0_i32_0 = arith.constant 0 : i32
    %c0_i32_1 = arith.constant 0 : i32
    return %c0_i32, %c0_i32_0 : i32, i32
  }
  func.func @transform_2(%arg0: i32) -> (i32, i32) {
    %c0_i32 = arith.constant 0 : i32
    %c0_i32_0 = arith.constant 0 : i32
    %c0_i32_1 = arith.constant 0 : i32
    return %c0_i32, %c0_i32_0 : i32, i32
  }
  func.func @transform_3(%arg0: i32) -> (i32, i32) {
    %c0_i32 = arith.constant 0 : i32
    %c0_i32_0 = arith.constant 0 : i32
    %c0_i32_1 = arith.constant 0 : i32
    return %c0_i32, %c0_i32_0 : i32, i32
  }
  func.func @transform_4(%arg0: i32) -> (i32, i32) {
    %c0_i32 = arith.constant 0 : i32
    %c0_i32_0 = arith.constant 0 : i32
    %c0_i32_1 = arith.constant 0 : i32
    return %c0_i32, %c0_i32_0 : i32, i32
  }
  func.func @transform_5(%arg0: i32) -> (i32, i32) {
    %c0_i32 = arith.constant 0 : i32
    %c0_i32_0 = arith.constant 0 : i32
    return %arg0, %c0_i32 : i32, i32
  }
}

</mosaic_0001>

<bundles_post_ra>
// kernel: tpu_custom_call.1
= control target key start
LH: loop header
LB: loop body
LE: loop exit
PB: predicated region body
PF: predicated region fallthrough
CT: control target
= control target key end

     0   :  { %10 = vsyncpa [#allocation3], 0  ;;  %s1088_s0 = inlined_call_operand.hbm [shape: f32[2,384], index: 0, kind: input, shape index: {}]   ;;  %s1089_s1 = inlined_call_operand.hbm [shape: bf16[384,256], index: 1, kind: input, shape index: {}]   ;;  %s1090_s2 = inlined_call_operand.vmem [shape: f32[1,256], index: 2, kind: input, shape index: {}]   ;;  %s1091_s3 = inlined_call_operand.hbm [shape: bf16[256,128], index: 3, kind: input, shape index: {}]   ;;  %s1092_s4 = inlined_call_operand.vmem [shape: f32[1,128], index: 4, kind: input, shape index: {}]   ;;  %s1093_s5 = inlined_call_operand.hbm [shape: f32[2,128], index: 5, kind: output, shape index: {}]  }
   0x1   :  { %11 = vsyncpa [#allocation6], 0 }
   0x2   :  { %12 = vsyncpa [#allocation4], 0 }
   0x3   :  { %17 = vsyncadd [#allocation3], 288  ;;  %s985_s18 = smov [#allocation5]   ;;  %s891_s22 = scalar_lea.hbm %s1089_s1, 6144 }
   0x4   :  { %s30_s19 = sshll.u32 %s985_s18, 4  ;;  %p892_p0 = scmp.ne.s32.totalorder %s1089_s1, %s891_s22  ;;  %s31_s19 = int_to_ptr.vmem [resolvable:$true] %s30_s19 }
   0x5   :  { %p895_p1 = scmp.lt.u32.totalorder %s891_s22, %s1089_s1 }
   0x7   :  { %p897_p2 = pnand %p895_p1, %p892_p0 }
   0x9   :  { %900 = shalt.err (!%p897_p2)
}
   0xa   :  { %s901_s27 = scalar_lea.vmem %s31_s19, 6144  ;;  %p906_p4 = scmp.lt.s32.totalorder %s31_s19, %s31_s19 }
   0xb   :  { %p902_p3 = scmp.ne.s32.totalorder %s31_s19, %s901_s27  ;;  %p907_p5 = scmp.lt.s32.totalorder %s901_s27, %s901_s27 }
   0xd   :  { %p908_p6 = por %p907_p5, %p906_p4 }
   0xf   :  { %p909_p7 = pnand %p908_p6, %p902_p3 }
  0x11   :  { %912 = shalt.err (!%p909_p7)
}
  0x12   :  { %s986_s28 = smov 128   ;;  %s987_s29 = smov 8  }
  0x13   :  { %36 = dma.hbm_to_vmem [thread:$0]  %s1089_s1, 6144, %s31_s19, [#allocation6], %s986_s28, %s986_s28, %s987_s29  }
  0x14   :  { %s988_s7 = smov [#allocation2]   ;;  %s913_s11 = scalar_lea.hbm %s1088_s0, 96 }
  0x15   :  { %s18_s8 = sshll.u32 %s988_s7, 4  ;;  %p914_p8 = scmp.ne.s32.totalorder %s1088_s0, %s913_s11  ;;  %s19_s8 = int_to_ptr.vmem [resolvable:$true] %s18_s8 }
  0x16   :  { %p917_p9 = scmp.lt.u32.totalorder %s913_s11, %s1088_s0 }
  0x18   :  { %p919_p10 = pnand %p917_p9, %p914_p8 }
  0x1a   :  { %922 = shalt.err (!%p919_p10)
}
  0x1b   :  { %s923_s16 = scalar_lea.vmem %s19_s8, 96  ;;  %s927_s1 = scalar_lea.vmem %s19_s8, 384 }
  0x1c   :  { %p924_p11 = scmp.ne.s32.totalorder %s19_s8, %s923_s16  ;;  %p928_p12 = scmp.lt.s32.totalorder %s19_s8, %s19_s8 }
  0x1d   :  { %p929_p13 = scmp.lt.s32.totalorder %s927_s1, %s923_s16 }
  0x1f   :  { %p930_p0 = por %p929_p13, %p928_p12 }
  0x21   :  { %p931_p1 = pnand %p930_p0, %p924_p11 }
  0x23   :  { %934 = shalt.err (!%p931_p1)
}
  0x24   :  { %s989_s17 = smov 96   ;;  %s990_s18 = smov 6  }
  0x25   :  { %24 = dma.hbm_to_vmem [thread:$0]  %s1088_s0, 96, %s19_s8, [#allocation3], %s989_s17, %s989_s17, %s990_s18  }
  0x26   :  { %s991_s21 = smov [#allocation7]   ;;  %s935_s25 = scalar_lea.hbm %s1091_s3, 2048 }
  0x27   :  { %s44_s22 = sshll.u32 %s991_s21, 4  ;;  %p936_p2 = scmp.ne.s32.totalorder %s1091_s3, %s935_s25  ;;  %s45_s22 = int_to_ptr.vmem [resolvable:$true] %s44_s22 }
  0x28   :  { %p939_p3 = scmp.lt.u32.totalorder %s935_s25, %s1091_s3 }
  0x2a   :  { %p941_p4 = pnand %p939_p3, %p936_p2 }
  0x2c   :  { %944 = shalt.err (!%p941_p4)
}
  0x2d   :  { %s945_s30 = scalar_lea.vmem %s45_s22, 2048  ;;  %p950_p6 = scmp.lt.s32.totalorder %s45_s22, %s45_s22 }
  0x2e   :  { %p946_p5 = scmp.ne.s32.totalorder %s45_s22, %s945_s30  ;;  %p951_p7 = scmp.lt.s32.totalorder %s945_s30, %s945_s30 }
  0x30   :  { %p952_p8 = por %p951_p7, %p950_p6 }
  0x32   :  { %p953_p9 = pnand %p952_p8, %p946_p5 }
  0x34   :  { %956 = shalt.err (!%p953_p9)
}
  0x35   :  { %s992_s0 = smov 64   ;;  %s993_s6 = smov 4  }
  0x36   :  { %50 = dma.hbm_to_vmem [thread:$0]  %s1091_s3, 2048, %s45_s22, [#allocation6], %s992_s0, %s992_s0, %s993_s6  }
  0x37   :  { %979 = dma.done.wait [#allocation3], 384  }
  0x38   :  { %980 = vsyncadd [#allocation3], 4294966912 }
  0x39   :  { %981 = dma.done.wait [#allocation6], 8192  }
  0x3a   :  { %982 = vsyncadd [#allocation6], 4294959104  ;;  %v994_v0 = vmov 0   ;;  %v797_v1 = vld [vmem:[#allocation5 + $0x4] ss:$8 sps:$4 sm:$0xff]   ;;  %v78_v26 = vlaneseq }
  0x3b   :  { %485 = vmatprep.mubr.bf16.mxu1 %v994_v0  ;;  %v799_v2 = vld [vmem:[#allocation5] ss:$8 sps:$4 sm:$0xff]   ;;  %412 = vmatprep.subr.bf16.mxu0 %v797_v1  ;;  %v800_v3 = vld [vmem:[#allocation5 + $0x14] ss:$8 sps:$4 sm:$0xff]   ;;  %v802_v4 = vld [vmem:[#allocation5 + $0x10] ss:$8 sps:$4 sm:$0xff]  }
  0x3c   :  { %413 = vmatpush1.bf16.msra.mxu0 %v799_v2  ;;  %v803_v5 = vld [vmem:[#allocation5 + $0x24] ss:$8 sps:$4 sm:$0xff]   ;;  %v805_v6 = vld [vmem:[#allocation5 + $0x20] ss:$8 sps:$4 sm:$0xff]   ;;  %v806_v7 = vld [vmem:[#allocation5 + $0x34] ss:$8 sps:$4 sm:$0xff]  }
  0x3d   :  { %414 = vmatprep.subr.bf16.mxu0 %v800_v3  ;;  %v808_v8 = vld [vmem:[#allocation5 + $0x30] ss:$8 sps:$4 sm:$0xff]   ;;  %v821_v9 = vld [vmem:[#allocation5 + $0x104] ss:$8 sps:$4 sm:$0xff]   ;;  %v825_v11 = vld [vmem:[#allocation5 + $0x100] ss:$8 sps:$4 sm:$0xff]  }
  0x3e   :  { %v809_v10 = vld [vmem:[#allocation5 + $0x44] ss:$8 sps:$4 sm:$0xff]   ;;  %453 = vmatprep.subr.bf16.mxu1 %v821_v9  ;;  %v827_v12 = vld [vmem:[#allocation5 + $0x114] ss:$8 sps:$4 sm:$0xff]   ;;  %v811_v13 = vld [vmem:[#allocation5 + $0x40] ss:$8 sps:$4 sm:$0xff]  }
  0x3f   :  { %454 = vmatpush1.bf16.msra.mxu1 %v825_v11  ;;  %v812_v14 = vld [vmem:[#allocation5 + $0x54] ss:$8 sps:$4 sm:$0xff]   ;;  %v831_v15 = vld [vmem:[#allocation5 + $0x110] ss:$8 sps:$4 sm:$0xff]   ;;  %v833_v16 = vld [vmem:[#allocation5 + $0x124] ss:$8 sps:$4 sm:$0xff]  }
  0x40   :  { %415 = vmatpush1.bf16.msra.mxu0 %v802_v4  ;;  %455 = vmatprep.subr.bf16.mxu1 %v827_v12  ;;  %v814_v17 = vld [vmem:[#allocation5 + $0x50] ss:$8 sps:$4 sm:$0xff]   ;;  %v837_v18 = vld [vmem:[#allocation5 + $0x120] ss:$8 sps:$4 sm:$0xff]   ;;  %v839_v19 = vld [vmem:[#allocation5 + $0x134] ss:$8 sps:$4 sm:$0xff]  }
  0x41   :  { %416 = vmatprep.subr.bf16.mxu0 %v803_v5  ;;  %v815_v20 = vld [vmem:[#allocation5 + $0x64] ss:$8 sps:$4 sm:$0xff]   ;;  %v843_v21 = vld [vmem:[#allocation5 + $0x130] ss:$8 sps:$4 sm:$0xff]   ;;  %v817_v22 = vld [vmem:[#allocation5 + $0x60] ss:$8 sps:$4 sm:$0xff]  }
  0x42   :  { %v845_v23 = vld [vmem:[#allocation5 + $0x144] ss:$8 sps:$4 sm:$0xff]   ;;  %v995_v24 = vmov 1983009808   ;;  %v818_v27 = vld [vmem:[#allocation5 + $0x74] ss:$8 sps:$4 sm:$0xff]  }
  0x43   :  { %456 = vmatpush1.bf16.msra.mxu1 %v831_v15  ;;  %v76_v25 = vunpack.c.l.s4 %v995_v24  ;;  %v820_v28 = vld [vmem:[#allocation5 + $0x70] ss:$8 sps:$4 sm:$0xff]   ;;  %v849_v29 = vld [vmem:[#allocation5 + $0x140] ss:$8 sps:$4 sm:$0xff]   ;;  %v851_v30 = vld [vmem:[#allocation5 + $0x154] ss:$8 sps:$4 sm:$0xff]  }
  0x44   :  { %417 = vmatpush1.bf16.msra.mxu0 %v805_v6  ;;  %457 = vmatprep.subr.bf16.mxu1 %v833_v16  ;;  %v1065_v32 = vshrl.u32 %v78_v26, 7  ;;  %v823_v33 = vld [vmem:[#allocation5 + $0x84] ss:$8 sps:$4 sm:$0xff]   ;;  %v855_v34 = vld [vmem:[#allocation5 + $0x150] ss:$8 sps:$4 sm:$0xff]  }
  0x45   :  { %418 = vmatprep.subr.bf16.mxu0 %v806_v7  ;;  %v77_v31 = vunpack.c.0.s8 %v76_v25  ;;  %v826_v35 = vld [vmem:[#allocation5 + $0x80] ss:$8 sps:$4 sm:$0xff]   ;;  %v829_v36 = vld [vmem:[#allocation5 + $0x94] ss:$8 sps:$4 sm:$0xff]   ;;  %v857_v37 = vld [vmem:[#allocation5 + $0x164] ss:$8 sps:$4 sm:$0xff]  }
  0x46   :  { %v861_v39 = vld [vmem:[#allocation5 + $0x160] ss:$8 sps:$4 sm:$0xff]   ;;  %v832_v40 = vld [vmem:[#allocation5 + $0x90] ss:$8 sps:$4 sm:$0xff]   ;;  %v863_v45 = vld [vmem:[#allocation5 + $0x174] ss:$8 sps:$4 sm:$0xff]  }
  0x47   :  { %458 = vmatpush1.bf16.msra.mxu1 %v837_v18  ;;  %v80_v38 = vsub.s32 %v77_v31, %v1065_v32  ;;  %v869_v41 = vld [vmem:[#allocation2] ss:$6 sps:$4 sm:$0xff]   ;;  %v872_v42 = vld [vmem:[#allocation2 + $0xc] ss:$6 sps:$4 sm:$0xff]   ;;  %v875_v56 = vld [vmem:[#allocation7 + $0x40] sm:$0xff]   ;;  %v164_v25 = vsub.s32 0, %v1065_v32 }
  0x48   :  { %419 = vmatpush1.bf16.msra.mxu0 %v808_v8  ;;  %459 = vmatprep.subr.bf16.mxu1 %v839_v19  ;;  %v871_v43 = vld [vmem:[#allocation2 + $0x4] ss:$6 sps:$4 sm:$0x33]   ;;  %v874_v44 = vld [vmem:[#allocation2 + $0x10] ss:$6 sps:$4 sm:$0x33]  }
  0x49   :  { %420 = vmatprep.subr.bf16.mxu0 %v809_v10  ;;  %v81_v46 = vrot.slane %v869_v41, %v80_v38  ;;  %v95_v47 = vrot.slane %v872_v42, %v80_v38  ;;  %v835_v48 = vld [vmem:[#allocation5 + $0xa4] ss:$8 sps:$4 sm:$0xff]   ;;  %v88_v49 = vrot.slane %v871_v43, %v80_v38  ;;  %v102_v50 = vrot.slane %v874_v44, %v80_v38  ;;  %v838_v51 = vld [vmem:[#allocation5 + $0xa0] ss:$8 sps:$4 sm:$0xff]   ;;  %v867_v53 = vld [vmem:[#allocation5 + $0x170] ss:$8 sps:$4 sm:$0xff]  }
  0x4a   :  { %v841_v57 = vld [vmem:[#allocation5 + $0xb4] ss:$8 sps:$4 sm:$0xff]   ;;  %v844_v58 = vld [vmem:[#allocation5 + $0xb0] ss:$8 sps:$4 sm:$0xff]   ;;  %v847_v60 = vld [vmem:[#allocation5 + $0xc4] ss:$8 sps:$4 sm:$0xff]  }
  0x4b   :  { %460 = vmatpush1.bf16.msra.mxu1 %v843_v21  ;;  %v104_v52 = vcombine.high %v81_v46, %v95_v47  ;;  %v105_v54 = vcombine.low %v88_v49, %v102_v50  ;;  %v876_v61 = vld [vmem:[#allocation7] sm:$0xff]   ;;  %v877_v62 = vld [vmem:[#allocation7 + $0x48] sm:$0xff]   ;;  %v879_v1 = vld [vmem:[#allocation7 + $0x50] sm:$0xff]   ;;  %v103_v11 = vcombine.low %v81_v46, %v95_v47 }
  0x4c   :  { %421 = vmatpush1.bf16.msra.mxu0 %v811_v13  ;;  %461 = vmatprep.subr.bf16.mxu1 %v845_v23  ;;  %v878_v63 = vld [vmem:[#allocation7 + $0x8] sm:$0xff]   ;;  %v853_v2 = vld [vmem:[#allocation5 + $0xd4] ss:$8 sps:$4 sm:$0xff]   ;;  %v856_v4 = vld [vmem:[#allocation5 + $0xd0] ss:$8 sps:$4 sm:$0xff]  }
  0x4d   :  { %422 = vmatprep.subr.bf16.mxu0 %v812_v14  ;;  %v110_v55 = vpack.c.bf16 %v104_v52, %v104_v52  ;;  %v111_v59 = vpack.c.bf16 %v105_v54, %v105_v54  ;;  %v850_v0 = vld [vmem:[#allocation5 + $0xc0] ss:$8 sps:$4 sm:$0xff]   ;;  %v880_v3 = vld [vmem:[#allocation7 + $0x10] sm:$0xff]   ;;  %v881_v5 = vld [vmem:[#allocation7 + $0x58] sm:$0xff]   ;;  %v109_v14 = vpack.c.bf16 %v103_v11, %v103_v11 }
  0x4e   :  { %v859_v6 = vld [vmem:[#allocation5 + $0xe4] ss:$8 sps:$4 sm:$0xff]   ;;  %v882_v7 = vld [vmem:[#allocation7 + $0x18] sm:$0xff]   ;;  %v862_v8 = vld [vmem:[#allocation5 + $0xe0] ss:$8 sps:$4 sm:$0xff]  }
  0x4f   :  { %462 = vmatpush1.bf16.msra.mxu1 %v849_v29  ;;  %444 = vmatprep.mubr.bf16.mxu0 %v110_v55  ;;  %v883_v9 = vld [vmem:[#allocation7 + $0x60] sm:$0xff]   ;;  %v865_v10 = vld [vmem:[#allocation5 + $0xf4] ss:$8 sps:$4 sm:$0xff]   ;;  %v868_v13 = vld [vmem:[#allocation5 + $0xf0] ss:$8 sps:$4 sm:$0xff]  }
  0x50   :  { %423 = vmatpush1.bf16.msra.mxu0 %v814_v17  ;;  %463 = vmatprep.subr.bf16.mxu1 %v851_v30  ;;  %v884_v12 = vld [vmem:[#allocation7 + $0x20] sm:$0xff]   ;;  %v885_v15 = vld [vmem:[#allocation7 + $0x68] sm:$0xff]   ;;  %v887_v17 = vld [vmem:[#allocation7 + $0x70] sm:$0xff]  }
  0x51   :  { %424 = vmatprep.subr.bf16.mxu0 %v815_v20  ;;  %v886_v16 = vld [vmem:[#allocation7 + $0x28] sm:$0xff]   ;;  %v888_v18 = vld [vmem:[#allocation7 + $0x30] sm:$0xff]   ;;  %v889_v19 = vld [vmem:[#allocation7 + $0x78] sm:$0xff]  }
  0x52   :  { %v890_v20 = vld [vmem:[#allocation7 + $0x38] sm:$0xff]   ;;  %v160_v26 = vld [vmem:[%s1090_s2] sm:$0x3] }
  0x53   :  { %464 = vmatpush1.bf16.msra.mxu1 %v855_v34 }
  0x54   :  { %425 = vmatpush1.bf16.msra.mxu0 %v817_v22  ;;  %465 = vmatprep.subr.bf16.mxu1 %v857_v37 }
  0x55   :  { %426 = vmatprep.subr.bf16.mxu0 %v818_v27  ;;  %v168_v27 = vsub.s32 1, %v1065_v32  ;;  %v740_v32 = vld [vmem:[%s1092_s4] ss:$0 sm:$0xff] }
  0x57   :  { %466 = vmatpush1.bf16.msra.mxu1 %v861_v39  ;;  %v169_v29 = vrot.slane %v160_v26, %v168_v27 }
  0x58   :  { %427 = vmatpush1.bf16.msra.mxu0 %v820_v28  ;;  %467 = vmatprep.subr.bf16.mxu1 %v863_v45  ;;  %v165_v28 = vrot.slane %v160_v26, %v164_v25 }
  0x59   :  { %428 = vmatprep.subr.bf16.mxu0 %v823_v33 }
  0x5b   :  { %468 = vmatpush1.bf16.msra.mxu1 %v867_v53 }
  0x5c   :  { %429 = vmatpush1.bf16.msra.mxu0 %v826_v35  ;;  %757 = vmatprep.subr.bf16.mxu1 %v875_v56 }
  0x5d   :  { %430 = vmatprep.subr.bf16.mxu0 %v829_v36 }
  0x5e   :  { %486 = vmatmul.mubr.bf16.vlgmr.msra.gmra.mrb[0].mxu1 %v111_v59 }
  0x5f   :  { %758 = vmatpush3.bf16.msra.mxu1 %v876_v61 }
  0x60   :  { %431 = vmatpush1.bf16.msra.mxu0 %v832_v40  ;;  %759 = vmatprep.subr.bf16.mxu1 %v877_v62 }
  0x61   :  { %432 = vmatprep.subr.bf16.mxu0 %v835_v48 }
  0x63   :  { %760 = vmatpush3.bf16.msra.mxu1 %v878_v63 }
  0x64   :  { %433 = vmatpush1.bf16.msra.mxu0 %v838_v51  ;;  %761 = vmatprep.subr.bf16.mxu1 %v879_v1 }
  0x65   :  { %434 = vmatprep.subr.bf16.mxu0 %v841_v57 }
  0x67   :  { %762 = vmatpush3.bf16.msra.mxu1 %v880_v3 }
  0x68   :  { %435 = vmatpush1.bf16.msra.mxu0 %v844_v58  ;;  %763 = vmatprep.subr.bf16.mxu1 %v881_v5 }
  0x69   :  { %436 = vmatprep.subr.bf16.mxu0 %v847_v60 }
  0x6b   :  { %764 = vmatpush3.bf16.msra.mxu1 %v882_v7 }
  0x6c   :  { %437 = vmatpush1.bf16.msra.mxu0 %v850_v0  ;;  %765 = vmatprep.subr.bf16.mxu1 %v883_v9 }
  0x6d   :  { %438 = vmatprep.subr.bf16.mxu0 %v853_v2 }
  0x6f   :  { %766 = vmatpush3.bf16.msra.mxu1 %v884_v12 }
  0x70   :  { %439 = vmatpush1.bf16.msra.mxu0 %v856_v4  ;;  %767 = vmatprep.subr.bf16.mxu1 %v885_v15 }
  0x71   :  { %440 = vmatprep.subr.bf16.mxu0 %v859_v6 }
  0x73   :  { %768 = vmatpush3.bf16.msra.mxu1 %v886_v16 }
  0x74   :  { %441 = vmatpush1.bf16.msra.mxu0 %v862_v8  ;;  %769 = vmatprep.subr.bf16.mxu1 %v887_v17 }
  0x75   :  { %442 = vmatprep.subr.bf16.mxu0 %v865_v10 }
  0x77   :  { %770 = vmatpush3.bf16.msra.mxu1 %v888_v18 }
  0x78   :  { %443 = vmatpush1.bf16.msra.mxu0 %v868_v13  ;;  %771 = vmatprep.subr.bf16.mxu1 %v889_v19 }
  0x7b   :  { %445 = vmatmul.mubr.bf16.vlgmr.msra.gmra.mrb[0].mxu0 %v109_v14  ;;  %772 = vmatpush3.bf16.msra.mxu1 %v890_v20 }
 0x131   :  { %v487_v21 = vpop.f32.mrb[0].mxu1 }
 0x132   :  { %v489_v22 = vpop.f32.mrb[1].mxu1 }
 0x133   :  { %v491_v23 = vpop.f32.mrb[2].mxu1 }
 0x134   :  { %v492_v24 = vpop.f32.mrb[3].mxu1 }
 0x14e   :  { %v446_v30 = vpop.f32.mrb[0].mxu0 }
 0x14f   :  { %v447_v31 = vadd.f32 %v446_v30, %v165_v28  ;;  %v448_v33 = vpop.f32.mrb[1].mxu0 }
 0x150   :  { %v449_v34 = vadd.f32 %v448_v33, %v169_v29  ;;  %v450_v35 = vpop.f32.mrb[2].mxu0 }
 0x151   :  { %v488_v36 = vadd.f32 %v487_v21, %v447_v31  ;;  %v451_v37 = vpop.f32.mrb[3].mxu0 }
 0x152   :  { %v490_v38 = vadd.f32 %v489_v22, %v449_v34 }
 0x153   :  { %v494_v39 = vmax.f32 %v488_v36, 0.0 }
 0x154   :  { %v495_v40 = vmax.f32 %v490_v38, 0.0 }
 0x155   :  { %v496_v42 = vpack.c.bf16 %v494_v39, %v494_v39 }
 0x156   :  { %v497_v41 = vpack.c.bf16 %v495_v40, %v495_v40 }
 0x158   :  { %665 = vmatprep.mubr.bf16.mxu1 %v497_v41 }
 0x159   :  { %666 = vmatmul.mubr.bf16.vlgmr.msra.gmra.mrb[4].mxu1 %v496_v42 }
 0x22c   :  { %v773_v43 = vpop.f32.mrb[4].mxu1 }
 0x22d   :  { %v774_v44 = vpop.f32.mrb[5].mxu1 }
 0x22e   :  { %v775_v45 = vadd.f32 %v774_v44, %v773_v43  ;;  %v776_v46 = vpop.f32.mrb[6].mxu1 }
 0x22f   :  { %v777_v47 = vpop.f32.mrb[7].mxu1 }
 0x230   :  { %v668_v48 = vadd.f32 %v775_v45, %v740_v32 }
 0x232   :  { %673 = vst [vmem:[#allocation8] sm:$0xff] %v668_v48 }
 0x233   :  { %678 = vsyncadd [#allocation4], 96  ;;  %s996_s11 = smov [#allocation8]  }
 0x234   :  { %s679_s12 = sshll.u32 %s996_s11, 4  ;;  %s680_s12 = int_to_ptr.vmem [resolvable:$true] %s679_s12 }
 0x235   :  { %s957_s13 = scalar_lea.vmem %s680_s12, 32  ;;  %s961_s14 = scalar_lea.vmem %s680_s12, 128 }
 0x236   :  { %p958_p10 = scmp.ne.s32.totalorder %s680_s12, %s957_s13  ;;  %p962_p11 = scmp.lt.s32.totalorder %s680_s12, %s680_s12 }
 0x237   :  { %p963_p12 = scmp.lt.s32.totalorder %s961_s14, %s957_s13 }
 0x239   :  { %p964_p13 = por %p963_p12, %p962_p11 }
 0x23b   :  { %p965_p0 = pnand %p964_p13, %p958_p10 }
 0x23d   :  { %968 = shalt.err (!%p965_p0)
}
 0x23e   :  { %s969_s16 = scalar_lea.hbm %s1093_s5, 32 }
 0x23f   :  { %p970_p1 = scmp.ne.s32.totalorder %s1093_s5, %s969_s16  ;;  %p973_p2 = scmp.lt.u32.totalorder %s969_s16, %s1093_s5 }
 0x241   :  { %p975_p3 = pnand %p973_p2, %p970_p1 }
 0x243   :  { %978 = shalt.err (!%p975_p3)
}
 0x244   :  { %s997_s20 = smov 32   ;;  %s998_s21 = smov 2  }
 0x245   :  { %685 = dma.vmem_to_hbm [thread:$0]  %s680_s12, 32, %s1093_s5, [#allocation4], %s997_s20, %s997_s20, %s998_s21  }
 0x246   :  { %983 = dma.done.wait [#allocation4], 128  }
 0x247   :  { %984 = vsyncadd [#allocation4], 4294967168 }
 0x248   :  { %689 = vsyncpa [#allocation3], 1 }
 0x249   :  { %690 = vsyncpa [#allocation6], 1 }
 0x24a   :  { %691 = vsyncpa [#allocation4], 1 }

</bundles_post_ra>
